<compile_context>
chip_gen: v6e
topology: v6e:2x2x1
jax: 0.10.0
libtpu: 0.0.40
codegen_flags: <defaults>
</compile_context>

<pallas_src>
import jax
import jax.numpy as jnp
from jax.experimental import pallas as pl
from jax.experimental.pallas import tpu as pltpu

_LANE = 128
_SUBLANE = 8
_MXU_M = 256  # M granularity that covers v6e/v7x (and is a multiple of v5e's 128)


def _round_up(x, m):
    return ((x + m - 1) // m) * m


# --------------------------------------------------------------------------
# Kernel: one batch tile per grid step, both layers fused, hidden stays in
# VMEM (never round-trips to HBM).
# --------------------------------------------------------------------------
def _autoencoder_kernel(x_ref, we_ref, be_ref, wd_ref, bd_ref, o_ref):
    # encoder: relu(x @ We + be)   (We is (D, Hp), bf16, already transposed)
    x = x_ref[...].astype(jnp.bfloat16)                       # cast in VMEM
    h = jnp.dot(x, we_ref[...], preferred_element_type=jnp.float32)
    h = jnp.maximum(h + be_ref[...], 0.0)                     # bias + relu in f32
    # decoder: sigmoid(h @ Wd + bd)  (Wd is (Hp, D), bf16)
    z = jnp.dot(h.astype(jnp.bfloat16), wd_ref[...],
                preferred_element_type=jnp.float32) + bd_ref[...]
    # sigmoid = 1 / (1 + exp(-z)): exp on the EUP, approx reciprocal on the EUP
    sig = pl.reciprocal(1.0 + jnp.exp(-z), approx=True)
    o_ref[...] = sig.astype(o_ref.dtype)


# --------------------------------------------------------------------------
# One-time parameter preparation (outside the per-call forward path).
# --------------------------------------------------------------------------
def prepare_params(w_enc, b_enc, w_dec, b_dec):
    """w_enc: (H, D), b_enc: (H,), w_dec: (D, H), b_dec: (D,)  (torch layout).

    Transposes to (in, out) once, zero-pads only the *hidden* dim to a
    multiple of 128 (purely internal; padded hidden units are relu(0)=0 and
    their decoder rows are zero, so they contribute nothing), and casts the
    weights to bf16.  The output feature dim is left unpadded so the kernel
    writes exactly D columns to HBM.
    """
    H, D = w_enc.shape
    Hp = _round_up(H, _LANE)

    we_t = jnp.pad(jnp.asarray(w_enc, jnp.float32).T,
                   ((0, 0), (0, Hp - H))).astype(jnp.bfloat16)        # (D, Hp)
    wd_t = jnp.pad(jnp.asarray(w_dec, jnp.float32).T,
                   ((0, Hp - H), (0, 0))).astype(jnp.bfloat16)        # (Hp, D)
    be = jnp.pad(jnp.asarray(b_enc, jnp.float32), (0, Hp - H)).reshape(1, Hp)
    bd = jnp.asarray(b_dec, jnp.float32).reshape(1, D)
    return dict(we_t=we_t, be=be, wd_t=wd_t, bd=bd, D=D, H=H, Hp=Hp)


def _vmem_budget_and_limit():
    """Generation-aware VMEM sizing (v5e/v6e: 128 MiB, v7x: 64 MiB/TC)."""
    cap = 64 * 1024 * 1024
    try:
        info = pltpu.get_tpu_info()
        cap = int(getattr(info, "vmem_capacity_bytes", cap) or cap)
    except Exception:
        pass
    limit = int(min(cap * 3 // 4, 100 * 1024 * 1024))   # explicit scoped limit
    budget = int(cap * 2 // 5)                           # ~40% for tile sizing
    return budget, limit


def _pick_batch_tile(batch, d, hp, budget_bytes):
    """Largest batch tile whose double-buffered tiles + resident weights fit
    the VMEM budget; MXU-M aligned; keeps >=2 grid steps for large batches."""
    gran = _MXU_M if batch >= 2 * _MXU_M else _SUBLANE
    # Pallas double-buffers every input (x2), even with a constant index_map.
    resident = 2 * (2 * d * hp + 2 * hp * d) + 2 * 4 * (hp + d)   # bf16 W, f32 b
    per_row = (2 * 4 * d          # double-buffered x tile (f32 in)
               + 2 * 2 * d        # double-buffered bf16 out tile
               + 4 * (hp + d)     # f32 intermediates (h, z)
               + 2 * (hp + d))    # bf16 casts of x / h
    avail = budget_bytes - resident
    if avail <= per_row * gran:
        # TODO(synk): for very large D*H (resident weights blow the budget),
        # tile Hp inside the kernel with an f32 accumulator scratch on an
        # 'arbitrary' reduction axis instead of holding both weights resident.
        return gran
    tb = avail // per_row
    # keep >=2 grid steps when the batch is large enough so v7x's two
    # TensorCores both get work on the "parallel" axis
    if batch >= 2 * gran:
        tb = min(tb, _round_up(pl.cdiv(batch, 2), gran))
    tb = min(tb, 4096, _round_up(batch, gran))
    tb = max(gran, (tb // gran) * gran)
    # rebalance so the last (ragged) tile isn't mostly padding
    steps = pl.cdiv(batch, tb)
    tb = max(gran, _round_up(pl.cdiv(batch, steps), gran))
    return int(tb)


# --------------------------------------------------------------------------
# Forward pass.
# --------------------------------------------------------------------------
def autoencoder_forward(x, params):
    we_t, be, wd_t, bd = params["we_t"], params["be"], params["wd_t"], params["bd"]
    D, Hp = params["D"], params["Hp"]
    B = x.shape[0]
    assert x.shape[1] == D, f"expected input_dim={D}, got {x.shape[1]}"

    budget, vmem_limit = _vmem_budget_and_limit()
    TB = _pick_batch_tile(B, D, Hp, budget)
    grid = (pl.cdiv(B, TB),)   # ragged last block: no wrapper-side padding of x

    out = pl.pallas_call(
        _autoencoder_kernel,
        out_shape=jax.ShapeDtypeStruct((B, D), jnp.bfloat16),
        grid=grid,
        in_specs=[
            pl.BlockSpec((TB, D), lambda i: (i, 0)),    # x tile (pipelined)
            pl.BlockSpec((D, Hp), lambda i: (0, 0)),    # W_enc^T (VMEM-resident)
            pl.BlockSpec((1, Hp), lambda i: (0, 0)),    # b_enc   (VMEM-resident)
            pl.BlockSpec((Hp, D), lambda i: (0, 0)),    # W_dec^T (VMEM-resident)
            pl.BlockSpec((1, D), lambda i: (0, 0)),     # b_dec   (VMEM-resident)
        ],
        out_specs=pl.BlockSpec((TB, D), lambda i: (i, 0)),
        compiler_params=pltpu.CompilerParams(
            dimension_semantics=("parallel",),
            vmem_limit_bytes=vmem_limit),
    )(x, we_t, be, wd_t, bd)
    return out   # bf16; caller may upcast if it needs f32


def _reference(x, w_enc, b_enc, w_dec, b_dec):
    h = jnp.maximum(x @ w_enc.T + b_enc, 0.0)
    return jax.nn.sigmoid(h @ w_dec.T + b_dec)


if __name__ == "__main__":
    # Small, module-consistent shapes: batch=64, input_dim=16, hidden_dim=32.
    B, input_dim, hidden_dim = 64, 16, 32

    key = jax.random.PRNGKey(0)
    kx, kx2, k1, k2, k3, k4 = jax.random.split(key, 6)

    # Deterministic synthetic parameters (torch nn.Linear shapes/init ranges).
    bound_e = 1.0 / jnp.sqrt(input_dim)
    bound_d = 1.0 / jnp.sqrt(hidden_dim)
    w_enc = jax.random.uniform(k1, (hidden_dim, input_dim), jnp.float32,
                               -bound_e, bound_e)
    b_enc = jax.random.uniform(k2, (hidden_dim,), jnp.float32,
                               -bound_e, bound_e)
    w_dec = jax.random.uniform(k3, (input_dim, hidden_dim), jnp.float32,
                               -bound_d, bound_d)
    b_dec = jax.random.uniform(k4, (input_dim,), jnp.float32,
                               -bound_d, bound_d)

    params = prepare_params(w_enc, b_enc, w_dec, b_dec)   # one-time prep

    x = jax.random.normal(kx, (B, input_dim), jnp.float32)
    out = jax.block_until_ready(autoencoder_forward(x, params))
    ref = _reference(x, w_enc, b_enc, w_dec, b_dec)
    assert out.shape == (B, input_dim)
    err = jnp.max(jnp.abs(out.astype(jnp.float32) - ref))
    assert err < 2.5e-2, f"max abs err {err}"

    # Ragged batch (exercises the cdiv-grid masked-boundary path, no padding).
    x2 = jax.random.normal(kx2, (13, input_dim), jnp.float32)
    out2 = jax.block_until_ready(autoencoder_forward(x2, params))
    ref2 = _reference(x2, w_enc, b_enc, w_dec, b_dec)
    assert out2.shape == (13, input_dim)
    err2 = jnp.max(jnp.abs(out2.astype(jnp.float32) - ref2))
    assert err2 < 2.5e-2, f"max abs err {err2}"

    print("KERNEL_OK")
</pallas_src>

<mosaic_0001>
module attributes {stable_mosaic.version = 11 : i64} {
  func.func @_autoencoder_kernel(%arg0: i32, %arg1: memref<32x16xf32, #tpu.memory_space<vmem>>, %arg2: memref<16x128xbf16, #tpu.memory_space<vmem>>, %arg3: memref<1x128xf32, #tpu.memory_space<vmem>>, %arg4: memref<128x16xbf16, #tpu.memory_space<vmem>>, %arg5: memref<1x16xf32, #tpu.memory_space<vmem>>, %arg6: memref<32x16xbf16, #tpu.memory_space<vmem>>) attributes {dimension_semantics = [#tpu.dimension_semantics<parallel>], iteration_bounds = array<i64: 2>, scalar_prefetch = 0 : i64, scratch_operands = 0 : i64, tpu.core_type = #tpu.core_type<tc>, window_params = [{transform_indices = @transform_0, window_bounds = array<i64: 32, 16>}, {pipeline_mode = #tpu.pipeline_mode<synchronous>, transform_indices = @transform_1, window_bounds = array<i64: 16, 128>}, {pipeline_mode = #tpu.pipeline_mode<synchronous>, transform_indices = @transform_2, window_bounds = array<i64: 1, 128>}, {pipeline_mode = #tpu.pipeline_mode<synchronous>, transform_indices = @transform_3, window_bounds = array<i64: 128, 16>}, {pipeline_mode = #tpu.pipeline_mode<synchronous>, transform_indices = @transform_4, window_bounds = array<i64: 1, 16>}, {transform_indices = @transform_5, window_bounds = array<i64: 32, 16>}]} {
    %c0 = arith.constant 0 : index
    %c0_0 = arith.constant 0 : index
    %0 = vector.load %arg1[%c0, %c0_0] : memref<32x16xf32, #tpu.memory_space<vmem>>, vector<32x16xf32>
    %1 = arith.truncf %0 : vector<32x16xf32> to vector<32x16xbf16>
    %c0_1 = arith.constant 0 : index
    %c0_2 = arith.constant 0 : index
    %2 = vector.load %arg2[%c0_1, %c0_2] : memref<16x128xbf16, #tpu.memory_space<vmem>>, vector<16x128xbf16>
    %cst = arith.constant dense<0.000000e+00> : vector<32x128xf32>
    %3 = tpu.matmul %1, %2, %cst {dimension_numbers = #tpu.dot_dimension_numbers<[1], [0], [0], [1], [0, 0, 1, 1], [], []>} : vector<32x16xbf16>, vector<16x128xbf16>, vector<32x128xf32> -> vector<32x128xf32>
    %c0_3 = arith.constant 0 : index
    %c0_4 = arith.constant 0 : index
    %4 = vector.load %arg3[%c0_3, %c0_4] : memref<1x128xf32, #tpu.memory_space<vmem>>, vector<1x128xf32>
    %5 = vector.broadcast %4 : vector<1x128xf32> to vector<32x128xf32>
    %6 = arith.addf %3, %5 : vector<32x128xf32>
    %cst_5 = arith.constant 0.000000e+00 : f32
    %7 = vector.broadcast %cst_5 : f32 to vector<32x128xf32>
    %8 = arith.maximumf %6, %7 : vector<32x128xf32>
    %9 = arith.truncf %8 : vector<32x128xf32> to vector<32x128xbf16>
    %c0_6 = arith.constant 0 : index
    %c0_7 = arith.constant 0 : index
    %10 = vector.load %arg4[%c0_6, %c0_7] : memref<128x16xbf16, #tpu.memory_space<vmem>>, vector<128x16xbf16>
    %cst_8 = arith.constant dense<0.000000e+00> : vector<32x16xf32>
    %11 = tpu.matmul %9, %10, %cst_8 {dimension_numbers = #tpu.dot_dimension_numbers<[1], [0], [0], [1], [0, 0, 1, 1], [], []>} : vector<32x128xbf16>, vector<128x16xbf16>, vector<32x16xf32> -> vector<32x16xf32>
    %c0_9 = arith.constant 0 : index
    %c0_10 = arith.constant 0 : index
    %12 = vector.load %arg5[%c0_9, %c0_10] : memref<1x16xf32, #tpu.memory_space<vmem>>, vector<1x16xf32>
    %13 = vector.broadcast %12 : vector<1x16xf32> to vector<32x16xf32>
    %14 = arith.addf %11, %13 : vector<32x16xf32>
    %cst_11 = arith.constant 0.000000e+00 : f32
    %15 = vector.broadcast %cst_11 : f32 to vector<32x16xf32>
    %16 = arith.subf %15, %14 : vector<32x16xf32>
    %17 = math.exp %16 : vector<32x16xf32>
    %cst_12 = arith.constant 1.000000e+00 : f32
    %18 = vector.broadcast %cst_12 : f32 to vector<32x16xf32>
    %19 = arith.addf %18, %17 : vector<32x16xf32>
    %20 = tpu.reciprocal %19 {approx = true} : vector<32x16xf32> -> vector<32x16xf32>
    %21 = arith.truncf %20 : vector<32x16xf32> to vector<32x16xbf16>
    %c0_13 = arith.constant 0 : index
    %c0_14 = arith.constant 0 : index
    %22 = vector.load %arg6[%c0_13, %c0_14] : memref<32x16xbf16, #tpu.memory_space<vmem>>, vector<32x16xbf16>
    tpu.vector_store %arg6[%c0_13, %c0_14], %21 {strides = array<i32>} : memref<32x16xbf16, #tpu.memory_space<vmem>>, vector<32x16xbf16>,
    return
  }
  func.func @transform_0(%arg0: i32) -> (i32, i32) {
    %c0_i32 = arith.constant 0 : i32
    %c0_i32_0 = arith.constant 0 : i32
    return %arg0, %c0_i32 : i32, i32
  }
  func.func @transform_1(%arg0: i32) -> (i32, i32) {
    %c0_i32 = arith.constant 0 : i32
    %c0_i32_0 = arith.constant 0 : i32
    %c0_i32_1 = arith.constant 0 : i32
    return %c0_i32, %c0_i32_0 : i32, i32
  }
  func.func @transform_2(%arg0: i32) -> (i32, i32) {
    %c0_i32 = arith.constant 0 : i32
    %c0_i32_0 = arith.constant 0 : i32
    %c0_i32_1 = arith.constant 0 : i32
    return %c0_i32, %c0_i32_0 : i32, i32
  }
  func.func @transform_3(%arg0: i32) -> (i32, i32) {
    %c0_i32 = arith.constant 0 : i32
    %c0_i32_0 = arith.constant 0 : i32
    %c0_i32_1 = arith.constant 0 : i32
    return %c0_i32, %c0_i32_0 : i32, i32
  }
  func.func @transform_4(%arg0: i32) -> (i32, i32) {
    %c0_i32 = arith.constant 0 : i32
    %c0_i32_0 = arith.constant 0 : i32
    %c0_i32_1 = arith.constant 0 : i32
    return %c0_i32, %c0_i32_0 : i32, i32
  }
  func.func @transform_5(%arg0: i32) -> (i32, i32) {
    %c0_i32 = arith.constant 0 : i32
    %c0_i32_0 = arith.constant 0 : i32
    return %arg0, %c0_i32 : i32, i32
  }
}

</mosaic_0001>

<bundles_post_ra>
// kernel: tpu_custom_call.1
= control target key start
LH: loop header
LB: loop body
LE: loop exit
PB: predicated region body
PF: predicated region fallthrough
CT: control target
= control target key end

     0   :  { %s671_s18 = smov 0   ;;  %s725_s0 = inlined_call_operand.vmem [shape: f32[64,16], index: 0, kind: input, shape index: {}]   ;;  %s726_s1 = inlined_call_operand.vmem [shape: bf16[16,128], index: 1, kind: input, shape index: {}]   ;;  %s727_s2 = inlined_call_operand.vmem [shape: f32[1,128], index: 2, kind: input, shape index: {}]   ;;  %s728_s3 = inlined_call_operand.vmem [shape: bf16[128,16], index: 3, kind: input, shape index: {}]   ;;  %s729_s4 = inlined_call_operand.vmem [shape: f32[1,16], index: 4, kind: input, shape index: {}]   ;;  %s730_s5 = inlined_call_operand.vmem [shape: bf16[64,16], index: 5, kind: output, shape index: {}]  }
   0x1 LB: > { %s529_s19 = sadd.s32 4294967295, %s639_s18   ;;  %p533_p0 = scmp.ge.s32.totalorder %s639_s18, 1  ;;  %s639_s18 = sphi %s671_s18, %s15_s18  }
   0x2   : > { %p188_p1 = scmp.lt.s32.totalorder %s639_s18, 3 }
   0x4   : > { %p189_p2 = pnand %p533_p0, %p188_p1 }
   0x5   : > { %s534_s22 = sshll.u32 (!%p189_p2), %s529_s19, 2 }
   0x6   : > { %192 = sbr.rel (%p189_p2) target bundleno = 462 (0x1ce), region = 40  ;;  %p217_p3 = scmp.lt.s32.totalorder (!%p189_p2), %s534_s22, 7 }
   0xb   : > { %v608_v0 = vld [vmem:[%s726_s1] sm:$0xff]   ;;  %v609_v1 = vld [vmem:[%s728_s3 + $0x38] sm:$0xff]   ;;  %s732_s22 = smov (!%p217_p3, %s534_s22), 7  ;;  %v610_v2 = vld [vmem:[%s728_s3 + $0x30] sm:$0xff]   ;;  %vm250_vm0 = vcmask 130048   ;;  %vm468_vm1 = vcmask 125952  }
   0xc   : > { %574 = vmatprep.subr.bf16.mxu0 %v608_v0  ;;  %580 = vmatprep.subr.bf16.mxu1 %v609_v1  ;;  %s535_s27 = sshll.u32 %s732_s22, 3  ;;  %v611_v3 = vld [vmem:[%s728_s3 + $0x28] sm:$0xff]   ;;  %v612_v10 = vld [vmem:[%s728_s3 + $0x20] sm:$0xff]   ;;  %v613_v11 = vld [vmem:[%s728_s3 + $0x18] sm:$0xff]   ;;  %s537_s24 = sshll.u32 %s732_s22, 2 }
   0xd   : > { %575 = vmatpush3.bf16.msra.mxu0 %v608_v0  ;;  %581 = vmatpush3.bf16.msra.mxu1 %v609_v1  ;;  %s220_s7 = scalar_lea.vmem %s725_s0, %s535_s27  ;;  %v614_v12 = vld [vmem:[%s728_s3 + $0x10] sm:$0xff]   ;;  %v615_v13 = vld [vmem:[%s728_s3 + $0x8] sm:$0xff]   ;;  %v616_v14 = vld [vmem:[%s728_s3] sm:$0xff]   ;;  %s226_s27 = scalar_lea.vmem %s730_s5, %s537_s24 }
   0xe   : > { %582 = vmatprep.subr.bf16.mxu1 %v610_v2  ;;  %v229_v4 = vld [vmem:[%s220_s7] sm:$0xff]  ;;  %v230_v5 = vld [vmem:[%s220_s7 + $0x8] sm:$0xff]  ;;  %v231_v6 = vld [vmem:[%s220_s7 + $0x10] sm:$0xff] }
   0xf   : > { %v233_v7 = vpack.c.bf16 %v230_v5, %v229_v4  ;;  %v232_v8 = vld [vmem:[%s220_s7 + $0x18] sm:$0xff]  ;;  %v538_v17 = vld [vmem:[%s727_s2] ss:$0 sm:$0xff] }
  0x10   : > { %v234_v9 = vpack.c.bf16 %v232_v8, %v231_v6  ;;  %v542_v30 = vld [vmem:[%s729_s4] ss:$0 sm:$0xff] }
  0x11   : > { %583 = vmatpush3.bf16.msra.mxu1 %v610_v2  ;;  %576 = vmatprep.mubr.msk.bf16.mxu0 %vm250_vm0, %v233_v7 }
  0x12   : > { %584 = vmatprep.subr.bf16.mxu1 %v611_v3  ;;  %577 = vmatmul.mubr.msk.bf16.vlgmr.msra.gmra.mxu0 %vm250_vm0, %v234_v9 }
  0x15   : > { %585 = vmatpush3.bf16.msra.mxu1 %v611_v3 }
  0x16   : > { %586 = vmatprep.subr.bf16.mxu1 %v612_v10 }
  0x19   : > { %587 = vmatpush3.bf16.msra.mxu1 %v612_v10 }
  0x1a   : > { %588 = vmatprep.subr.bf16.mxu1 %v613_v11 }
  0x1d   : > { %589 = vmatpush3.bf16.msra.mxu1 %v613_v11 }
  0x1e   : > { %590 = vmatprep.subr.bf16.mxu1 %v614_v12 }
  0x21   : > { %591 = vmatpush3.bf16.msra.mxu1 %v614_v12 }
  0x22   : > { %592 = vmatprep.subr.bf16.mxu1 %v615_v13 }
  0x25   : > { %593 = vmatpush3.bf16.msra.mxu1 %v615_v13 }
  0x26   : > { %594 = vmatprep.subr.bf16.mxu1 %v616_v14 }
  0x29   : > { %595 = vmatpush3.bf16.msra.mxu1 %v616_v14 }
  0xd2   : > { %v578_v15 = vpop.f32.mrf.mxu0 }
  0xd3   : > { %v300_v21 = vadd.f32 %v578_v15, %v538_v17 }
  0xd4   : > { %v291_v16 = vpop.f32.mrf.mxu0 }
  0xd5   : > { %v292_v19 = vadd.f32 %v538_v17, %v291_v16  ;;  %v308_v27 = vmax.f32 %v300_v21, 0.0 }
  0xd6   : > { %v579_v18 = vpop.f32.mrf.mxu0 }
  0xd7   : > { %v303_v20 = vadd.f32 %v579_v18, %v538_v17  ;;  %v306_v25 = vmax.f32 %v292_v19, 0.0 }
  0xd8   : > { %v294_v22 = vpop.f32.mrf.mxu0 }
  0xd9   : > { %v295_v23 = vadd.f32 %v538_v17, %v294_v22  ;;  %v309_v24 = vmax.f32 %v303_v20, 0.0 }
  0xdb   : > { %v307_v26 = vmax.f32 %v295_v23, 0.0  ;;  %v311_v29 = vpack.c.bf16 %v309_v24, %v308_v27 }
  0xdd   : > { %v310_v28 = vpack.c.bf16 %v307_v26, %v306_v25 }
  0xdf   : > { %596 = vmatprep.mubr.bf16.mxu1 %v310_v28 }
  0xe0   : > { %597 = vmatmul.mubr.bf16.vlgmr.msra.gmra.mxu1 %v311_v29 }
 0x1a0   : > { %v598_v31 = vpop.f32.mrf.mxu1 }
 0x1a1   : > { %v426_v32 = vadd.f32 %v598_v31, %v542_v30 }
 0x1a2   : > { %v417_v33 = vpop.f32.mrf.mxu1 }
 0x1a3   : > { %v434_v34 = vsub.f32 0.0, %v426_v32  ;;  %v418_v35 = vadd.f32 %v542_v30, %v417_v33 }
 0x1a4   : > { %v599_v36 = vpop.f32.mrf.mxu1 }
 0x1a5   : > { %v440_v37 = vmul.f32 1.442695, %v434_v34  ;;  %v432_v38 = vsub.f32 0.0, %v418_v35  ;;  %v429_v39 = vadd.f32 %v599_v36, %v542_v30 }
 0x1a6   : > { %v420_v40 = vpop.f32.mrf.mxu1 }
 0x1a7   : > { %617 = vpow2.f32 %v440_v37  ;;  %v436_v41 = vmul.f32 1.442695, %v432_v38  ;;  %v435_v42 = vsub.f32 0.0, %v429_v39  ;;  %v421_v43 = vadd.f32 %v542_v30, %v420_v40 }
 0x1a9   : > { %619 = vpow2.f32 %v436_v41  ;;  %v442_v44 = vmul.f32 1.442695, %v435_v42  ;;  %v433_v45 = vsub.f32 0.0, %v421_v43 }
 0x1ab   : > { %621 = vpow2.f32 %v442_v44  ;;  %v438_v46 = vmul.f32 1.442695, %v433_v45 }
 0x1ad   : > { %623 = vpow2.f32 %v438_v46 }
 0x1b4   : > { %v618_v47 = vpop.eup %617 }
 0x1b5   : > { %v446_v49 = vadd.f32 1.0, %v618_v47 }
 0x1b6   : > { %v620_v48 = vpop.eup %619 }
 0x1b7   : > { %v444_v50 = vadd.f32 1.0, %v620_v48 }
 0x1b8   : > { %v622_v51 = vpop.eup %621 }
 0x1b9   : > { %625 = vrcp.f32 %v444_v50  ;;  %v447_v52 = vadd.f32 1.0, %v622_v51 }
 0x1ba   : > { %v624_v53 = vpop.eup %623  ;;  %627 = vrcp.f32 %v446_v49 }
 0x1bb   : > { %v445_v54 = vadd.f32 1.0, %v624_v53  ;;  %629 = vrcp.f32 %v447_v52 }
 0x1bd   : > { %631 = vrcp.f32 %v445_v54 }
 0x1c6   : > { %v626_v55 = vpop.eup %625 }
 0x1c7   : > { %v557_v56 = vpack.c.bf16 %v626_v55, %v626_v55  ;;  %v628_v57 = vpop.eup %627 }
 0x1c8   : > { %v630_v58 = vpop.eup %629  ;;  %v559_v61 = vpack.c.bf16 %v628_v57, %v628_v57 }
 0x1c9   : > { %469 = vst.msk [vmem:[%s226_s27] sm:$0xf] %vm468_vm1, %v557_v56  ;;  %v560_v62 = vpack.c.bf16 %v630_v58, %v630_v58 }
 0x1ca   : > { %v632_v59 = vpop.eup %631  ;;  %471 = vst.msk [vmem:[%s226_s27 + $0x8] sm:$0xf] %vm468_vm1, %v559_v61 }
 0x1cb   : > { %v558_v60 = vpack.c.bf16 %v632_v59, %v632_v59  ;;  %472 = vst.msk [vmem:[%s226_s27 + $0xc] sm:$0xf] %vm468_vm1, %v560_v62 }
 0x1cd   : > { %470 = vst.msk [vmem:[%s226_s27 + $0x4] sm:$0xf] %vm468_vm1, %v558_v60 }
 0x1ce PF: > { %s15_s18 = sadd.s32 1, %s639_s18  }
 0x1cf   : > { %p12_p4 = scmp.ge.s32.totalorder %s15_s18, 4  }
 0x1d1   :  { %14 = sbr.rel (!%p12_p4) target bundleno = 1 (0x1), region = 70 }

</bundles_post_ra>
